<compile_context>
chip_gen: v5e
topology: v5e:2x2
jax: 0.10.0
libtpu: 0.0.40
codegen_flags: <defaults>
</compile_context>

<pallas_src>
import functools

import jax
import jax.numpy as jnp
from jax.experimental import pallas as pl
from jax.experimental.pallas import tpu as pltpu

IN_FEATS = 110      # state features (PyTorch Linear(110, 20))
HID = 20            # hidden units
PAD = 128           # lane-aligned padded width for features / hidden / nA
TB_MAX = 2048       # max batch rows per grid step


def _round_up(x, m):
    return ((x + m - 1) // m) * m


def dst_kernel(x_ref, w1_ref, b1_ref, w2_ref, b2_ref, o_ref):
    # --- Linear(110->20) (padded to 128->128) + Tanh ---
    x = x_ref[...]                                               # (TB, 128) f32
    h = jnp.dot(x, w1_ref[...], preferred_element_type=jnp.float32)
    h = jnp.tanh(h + b1_ref[...])                                # padded cols -> tanh(0) = 0

    # --- Linear(20->nA) (padded to 128->128) ---
    logits = jnp.dot(h, w2_ref[...], preferred_element_type=jnp.float32)
    logits = logits + b2_ref[...]                                # padded cols get -1e30

    # --- LogSoftmax along last axis (numerically stable) ---
    m = jnp.max(logits, axis=-1, keepdims=True)
    shifted = logits - m
    lse = jnp.log(jnp.sum(jnp.exp(shifted), axis=-1, keepdims=True))
    o_ref[...] = (shifted - lse).astype(o_ref.dtype)


@functools.partial(jax.jit, static_argnames=("nA",))
def dst_forward(state, w1, b1, w2, b2, nA):
    """state: (B, 110) f32; w1:(110,20), b1:(20,), w2:(20,nA), b2:(nA,).

    Returns (B, nA) f32 log-probabilities (== PyTorch LogSoftmax(dim=-1)).
    Weights are (in_features, out_features), i.e. transposed vs. nn.Linear.
    """
    B = state.shape[0]
    f32 = jnp.float32

    # ---- one-time, hoisted padding to lane/sublane-friendly shapes ----
    TB = min(TB_MAX, _round_up(B, 8))
    B_pad = _round_up(B, TB)

    x_p = jnp.zeros((B_pad, PAD), f32).at[:B, :IN_FEATS].set(state.astype(f32))
    w1_p = jnp.zeros((PAD, PAD), f32).at[:IN_FEATS, :HID].set(w1.astype(f32))
    b1_p = jnp.zeros((1, PAD), f32).at[0, :HID].set(b1.astype(f32).reshape(-1))
    w2_p = jnp.zeros((PAD, PAD), f32).at[:HID, :nA].set(w2.astype(f32))
    # padded logit columns -> -1e30 so exp() of them contributes 0 to the lse
    b2_p = jnp.full((1, PAD), -1e30, f32).at[0, :nA].set(b2.astype(f32).reshape(-1))

    grid = (B_pad // TB,)
    out_padded = pl.pallas_call(
        dst_kernel,
        out_shape=jax.ShapeDtypeStruct((B_pad, PAD), f32),
        grid_spec=pltpu.PrefetchScalarGridSpec(
            num_scalar_prefetch=0,
            grid=grid,
            in_specs=[
                pl.BlockSpec((TB, PAD), lambda i: (i, 0)),   # x: streamed per tile
                pl.BlockSpec((PAD, PAD), lambda i: (0, 0)),  # w1: VMEM-resident
                pl.BlockSpec((1, PAD), lambda i: (0, 0)),    # b1: VMEM-resident
                pl.BlockSpec((PAD, PAD), lambda i: (0, 0)),  # w2: VMEM-resident
                pl.BlockSpec((1, PAD), lambda i: (0, 0)),    # b2: VMEM-resident
            ],
            out_specs=pl.BlockSpec((TB, PAD), lambda i: (i, 0)),
        ),
        compiler_params=pltpu.CompilerParams(
            dimension_semantics=("parallel",),
        ),
    )(x_p, w1_p, b1_p, w2_p, b2_p)

    return out_padded[:B, :nA]


def init_params(key, nA, dtype=jnp.float32):
    """Deterministic init (uniform, like PyTorch's default Linear init)."""
    k1, k2, k3, k4 = jax.random.split(key, 4)
    bound1 = 1.0 / jnp.sqrt(IN_FEATS)
    bound2 = 1.0 / jnp.sqrt(HID)
    w1 = jax.random.uniform(k1, (IN_FEATS, HID), dtype, -bound1, bound1)
    b1 = jax.random.uniform(k2, (HID,), dtype, -bound1, bound1)
    w2 = jax.random.uniform(k3, (HID, nA), dtype, -bound2, bound2)
    b2 = jax.random.uniform(k4, (nA,), dtype, -bound2, bound2)
    return w1, b1, w2, b2


if __name__ == "__main__":
    key = jax.random.PRNGKey(0)
    k_in, k_par = jax.random.split(key)

    B, nA = 8, 4
    state = jax.random.normal(k_in, (B, IN_FEATS), dtype=jnp.float32)
    w1, b1, w2, b2 = init_params(k_par, nA)

    out = dst_forward(state, w1, b1, w2, b2, nA)
    out = jax.block_until_ready(out)

    # Pure-JAX reference of the same math (unpadded).
    h_ref = jnp.tanh(state @ w1 + b1[None, :])
    logits_ref = h_ref @ w2 + b2[None, :]
    ref = jax.nn.log_softmax(logits_ref, axis=-1)

    assert out.shape == (B, nA)
    assert jnp.allclose(out, ref, atol=1e-5, rtol=1e-5)

    print("KERNEL_OK")
</pallas_src>

<mosaic_0001>
module attributes {stable_mosaic.version = 11 : i64} {
  func.func @dst_kernel(%arg0: i32, %arg1: memref<8x128xf32, #tpu.memory_space<vmem>>, %arg2: memref<128x128xf32, #tpu.memory_space<vmem>>, %arg3: memref<1x128xf32, #tpu.memory_space<vmem>>, %arg4: memref<128x128xf32, #tpu.memory_space<vmem>>, %arg5: memref<1x128xf32, #tpu.memory_space<vmem>>, %arg6: memref<8x128xf32, #tpu.memory_space<vmem>>) attributes {dimension_semantics = [#tpu.dimension_semantics<parallel>], iteration_bounds = array<i64: 1>, scalar_prefetch = 0 : i64, scratch_operands = 0 : i64, tpu.core_type = #tpu.core_type<tc>, window_params = [{transform_indices = @transform_0, window_bounds = array<i64: 8, 128>}, {pipeline_mode = #tpu.pipeline_mode<synchronous>, transform_indices = @transform_1, window_bounds = array<i64: 128, 128>}, {pipeline_mode = #tpu.pipeline_mode<synchronous>, transform_indices = @transform_2, window_bounds = array<i64: 1, 128>}, {pipeline_mode = #tpu.pipeline_mode<synchronous>, transform_indices = @transform_3, window_bounds = array<i64: 128, 128>}, {pipeline_mode = #tpu.pipeline_mode<synchronous>, transform_indices = @transform_4, window_bounds = array<i64: 1, 128>}, {transform_indices = @transform_5, window_bounds = array<i64: 8, 128>}]} {
    %c0 = arith.constant 0 : index
    %c0_0 = arith.constant 0 : index
    %0 = vector.load %arg1[%c0, %c0_0] : memref<8x128xf32, #tpu.memory_space<vmem>>, vector<8x128xf32>
    %c0_1 = arith.constant 0 : index
    %c0_2 = arith.constant 0 : index
    %1 = vector.load %arg2[%c0_1, %c0_2] : memref<128x128xf32, #tpu.memory_space<vmem>>, vector<128x128xf32>
    %cst = arith.constant dense<0.000000e+00> : vector<8x128xf32>
    %2 = tpu.matmul %0, %1, %cst {dimension_numbers = #tpu.dot_dimension_numbers<[1], [0], [0], [1], [0, 0, 1, 1], [], []>} : vector<8x128xf32>, vector<128x128xf32>, vector<8x128xf32> -> vector<8x128xf32>
    %c0_3 = arith.constant 0 : index
    %c0_4 = arith.constant 0 : index
    %3 = vector.load %arg3[%c0_3, %c0_4] : memref<1x128xf32, #tpu.memory_space<vmem>>, vector<1x128xf32>
    %4 = vector.broadcast %3 : vector<1x128xf32> to vector<8x128xf32>
    %5 = arith.addf %2, %4 : vector<8x128xf32>
    %6 = math.tanh %5 : vector<8x128xf32>
    %c0_5 = arith.constant 0 : index
    %c0_6 = arith.constant 0 : index
    %7 = vector.load %arg4[%c0_5, %c0_6] : memref<128x128xf32, #tpu.memory_space<vmem>>, vector<128x128xf32>
    %cst_7 = arith.constant dense<0.000000e+00> : vector<8x128xf32>
    %8 = tpu.matmul %6, %7, %cst_7 {dimension_numbers = #tpu.dot_dimension_numbers<[1], [0], [0], [1], [0, 0, 1, 1], [], []>} : vector<8x128xf32>, vector<128x128xf32>, vector<8x128xf32> -> vector<8x128xf32>
    %c0_8 = arith.constant 0 : index
    %c0_9 = arith.constant 0 : index
    %9 = vector.load %arg5[%c0_8, %c0_9] : memref<1x128xf32, #tpu.memory_space<vmem>>, vector<1x128xf32>
    %10 = vector.broadcast %9 : vector<1x128xf32> to vector<8x128xf32>
    %11 = arith.addf %8, %10 : vector<8x128xf32>
    %cst_10 = arith.constant dense<0xFF800000> : vector<8xf32>
    %12 = vector.multi_reduction <maximumf>, %11, %cst_10 [1] : vector<8x128xf32> to vector<8xf32>
    %13 = vector.shape_cast %12 : vector<8xf32> to vector<8x1xf32>
    %14 = vector.broadcast %13 : vector<8x1xf32> to vector<8x128xf32>
    %15 = arith.subf %11, %14 : vector<8x128xf32>
    %16 = math.exp %15 : vector<8x128xf32>
    %cst_11 = arith.constant dense<0.000000e+00> : vector<8xf32>
    %17 = vector.multi_reduction <add>, %16, %cst_11 [1] : vector<8x128xf32> to vector<8xf32>
    %18 = vector.shape_cast %17 : vector<8xf32> to vector<8x1xf32>
    %19 = math.log %18 : vector<8x1xf32>
    %20 = vector.broadcast %19 : vector<8x1xf32> to vector<8x128xf32>
    %21 = arith.subf %15, %20 : vector<8x128xf32>
    %c0_12 = arith.constant 0 : index
    %c0_13 = arith.constant 0 : index
    %22 = vector.load %arg6[%c0_12, %c0_13] : memref<8x128xf32, #tpu.memory_space<vmem>>, vector<8x128xf32>
    tpu.vector_store %arg6[%c0_12, %c0_13], %21 {strides = array<i32>} : memref<8x128xf32, #tpu.memory_space<vmem>>, vector<8x128xf32>,
    return
  }
  func.func @transform_0(%arg0: i32) -> (i32, i32) {
    %c0_i32 = arith.constant 0 : i32
    %c0_i32_0 = arith.constant 0 : i32
    return %arg0, %c0_i32 : i32, i32
  }
  func.func @transform_1(%arg0: i32) -> (i32, i32) {
    %c0_i32 = arith.constant 0 : i32
    %c0_i32_0 = arith.constant 0 : i32
    %c0_i32_1 = arith.constant 0 : i32
    return %c0_i32, %c0_i32_0 : i32, i32
  }
  func.func @transform_2(%arg0: i32) -> (i32, i32) {
    %c0_i32 = arith.constant 0 : i32
    %c0_i32_0 = arith.constant 0 : i32
    %c0_i32_1 = arith.constant 0 : i32
    return %c0_i32, %c0_i32_0 : i32, i32
  }
  func.func @transform_3(%arg0: i32) -> (i32, i32) {
    %c0_i32 = arith.constant 0 : i32
    %c0_i32_0 = arith.constant 0 : i32
    %c0_i32_1 = arith.constant 0 : i32
    return %c0_i32, %c0_i32_0 : i32, i32
  }
  func.func @transform_4(%arg0: i32) -> (i32, i32) {
    %c0_i32 = arith.constant 0 : i32
    %c0_i32_0 = arith.constant 0 : i32
    %c0_i32_1 = arith.constant 0 : i32
    return %c0_i32, %c0_i32_0 : i32, i32
  }
  func.func @transform_5(%arg0: i32) -> (i32, i32) {
    %c0_i32 = arith.constant 0 : i32
    %c0_i32_0 = arith.constant 0 : i32
    return %arg0, %c0_i32 : i32, i32
  }
}

</mosaic_0001>

<bundles_post_ra>
// kernel: dst_forward.1
= control target key start
LH: loop header
LB: loop body
LE: loop exit
PB: predicated region body
PF: predicated region fallthrough
CT: control target
= control target key end

     0   :  { %s263_s1 = inlined_call_operand.vmem [shape: f32[128,128], index: 1, kind: input, shape index: {}]   ;;  %s264_s3 = inlined_call_operand.vmem [shape: f32[128,128], index: 3, kind: input, shape index: {}]   ;;  %s265_s2 = inlined_call_operand.vmem [shape: f32[1,128], index: 2, kind: input, shape index: {}]   ;;  %s266_s0 = inlined_call_operand.vmem [shape: f32[8,128], index: 0, kind: input, shape index: {}]   ;;  %s267_s4 = inlined_call_operand.vmem [shape: f32[1,128], index: 4, kind: input, shape index: {}]   ;;  %s268_s5 = inlined_call_operand.vmem [shape: f32[8,128], index: 5, kind: output, shape index: {}]  }
   0x1   :  { %v36_v0 = vld [vmem:[%s263_s1 + $0x78] sm:$0xff]  ;;  %v35_v1 = vld [vmem:[%s263_s1 + $0x70] sm:$0xff]  ;;  %v34_v2 = vld [vmem:[%s263_s1 + $0x68] sm:$0xff] }
   0x2   :  { %41 = vmatpush.msra.mxu0 %v36_v0  ;;  %v33_v3 = vld [vmem:[%s263_s1 + $0x60] sm:$0xff]  ;;  %v77_v4 = vld [vmem:[%s264_s3 + $0x78] sm:$0xff]  ;;  %v76_v6 = vld [vmem:[%s264_s3 + $0x70] sm:$0xff] }
   0x3   :  { %v32_v5 = vld [vmem:[%s263_s1 + $0x58] sm:$0xff]  ;;  %82 = vmatpush.msra.mxu1 %v77_v4  ;;  %v75_v7 = vld [vmem:[%s264_s3 + $0x68] sm:$0xff]  ;;  %v31_v8 = vld [vmem:[%s263_s1 + $0x50] sm:$0xff] }
   0x4   :  { %42 = vmatpush.msra.mxu0 %v35_v1  ;;  %v74_v9 = vld [vmem:[%s264_s3 + $0x60] sm:$0xff]  ;;  %v30_v10 = vld [vmem:[%s263_s1 + $0x48] sm:$0xff]  ;;  %v73_v11 = vld [vmem:[%s264_s3 + $0x58] sm:$0xff] }
   0x5   :  { %83 = vmatpush.msra.mxu1 %v76_v6  ;;  %v29_v12 = vld [vmem:[%s263_s1 + $0x40] sm:$0xff]  ;;  %v72_v13 = vld [vmem:[%s264_s3 + $0x50] sm:$0xff]  ;;  %v28_v14 = vld [vmem:[%s263_s1 + $0x38] sm:$0xff] }
   0x6   :  { %43 = vmatpush.msra.mxu0 %v34_v2  ;;  %v71_v15 = vld [vmem:[%s264_s3 + $0x48] sm:$0xff]  ;;  %v27_v16 = vld [vmem:[%s263_s1 + $0x30] sm:$0xff]  ;;  %v70_v17 = vld [vmem:[%s264_s3 + $0x40] sm:$0xff] }
   0x7   :  { %84 = vmatpush.msra.mxu1 %v75_v7  ;;  %v26_v18 = vld [vmem:[%s263_s1 + $0x28] sm:$0xff]  ;;  %v69_v19 = vld [vmem:[%s264_s3 + $0x38] sm:$0xff]  ;;  %v25_v20 = vld [vmem:[%s263_s1 + $0x20] sm:$0xff] }
   0x8   :  { %44 = vmatpush.msra.mxu0 %v33_v3  ;;  %v68_v21 = vld [vmem:[%s264_s3 + $0x30] sm:$0xff]  ;;  %v24_v22 = vld [vmem:[%s263_s1 + $0x18] sm:$0xff]  ;;  %v67_v23 = vld [vmem:[%s264_s3 + $0x28] sm:$0xff] }
   0x9   :  { %85 = vmatpush.msra.mxu1 %v74_v9  ;;  %v23_v24 = vld [vmem:[%s263_s1 + $0x10] sm:$0xff]  ;;  %v22_v25 = vld [vmem:[%s263_s1 + $0x8] sm:$0xff]  ;;  %v21_v26 = vld [vmem:[%s263_s1] sm:$0xff] }
   0xa   :  { %45 = vmatpush.msra.mxu0 %v32_v5  ;;  %v20_v27 = vld [vmem:[%s266_s0] sm:$0xff]  ;;  %v65_v29 = vld [vmem:[%s264_s3 + $0x18] sm:$0xff]  ;;  %v64_v30 = vld [vmem:[%s264_s3 + $0x10] sm:$0xff] }
   0xb   :  { %86 = vmatpush.msra.mxu1 %v73_v11  ;;  %v66_v28 = vld [vmem:[%s264_s3 + $0x20] sm:$0xff]  ;;  %v63_v31 = vld [vmem:[%s264_s3 + $0x8] sm:$0xff] }
   0xc   :  { %46 = vmatpush.msra.mxu0 %v31_v8  ;;  %v62_v32 = vld [vmem:[%s264_s3] sm:$0xff] }
   0xd   :  { %87 = vmatpush.msra.mxu1 %v72_v13  ;;  %v117_v33 = vld [vmem:[%s265_s2] ss:$0 sm:$0xff] }
   0xe   :  { %47 = vmatpush.msra.mxu0 %v30_v10  ;;  %v118_v37 = vld [vmem:[%s267_s4] ss:$0 sm:$0xff] }
   0xf   :  { %88 = vmatpush.msra.mxu1 %v71_v15 }
  0x10   :  { %48 = vmatpush.msra.mxu0 %v29_v12 }
  0x11   :  { %89 = vmatpush.msra.mxu1 %v70_v17 }
  0x12   :  { %49 = vmatpush.msra.mxu0 %v28_v14 }
  0x13   :  { %90 = vmatpush.msra.mxu1 %v69_v19 }
  0x14   :  { %50 = vmatpush.msra.mxu0 %v27_v16 }
  0x15   :  { %91 = vmatpush.msra.mxu1 %v68_v21 }
  0x16   :  { %51 = vmatpush.msra.mxu0 %v26_v18 }
  0x17   :  { %92 = vmatpush.msra.mxu1 %v67_v23 }
  0x18   :  { %52 = vmatpush.msra.mxu0 %v25_v20 }
  0x19   :  { %93 = vmatpush.msra.mxu1 %v66_v28 }
  0x1a   :  { %53 = vmatpush.msra.mxu0 %v24_v22 }
  0x1b   :  { %94 = vmatpush.msra.mxu1 %v65_v29 }
  0x1c   :  { %54 = vmatpush.msra.mxu0 %v23_v24 }
  0x1d   :  { %95 = vmatpush.msra.mxu1 %v64_v30 }
  0x1e   :  { %55 = vmatpush.msra.mxu0 %v22_v25 }
  0x1f   :  { %96 = vmatpush.msra.mxu1 %v63_v31 }
  0x20   :  { %56 = vmatpush.msra.mxu0 %v21_v26 }
  0x21   :  { %57 = vmatmul.f32.vlgmr.msra.gmra.mxu0 %v20_v27  ;;  %97 = vmatpush.msra.mxu1 %v62_v32 }
  0x9e   :  { %v58_v34 = vpop.f32.mrf.mxu0 }
  0x9f   :  { %v59_v35 = vadd.f32 %v117_v33, %v58_v34 }
  0xa1   :  { %119 = vtanh.f32 %v59_v35 }
  0xa7   :  { %v120_v36 = vpop.eup %119 }
  0xa8   :  { %98 = vmatmul.f32.vlgmr.msra.gmra.mxu1 %v120_v36 }
 0x125   :  { %v99_v38 = vpop.f32.mrf.mxu1 }
 0x126   :  { %v100_v39 = vadd.f32 %v118_v37, %v99_v38 }
 0x128   :  { %102 = vmax.xlane.f32.xlu0 %v100_v39 }
 0x19b   :  { %v103_v40 = vpop.xlane.xlu0 %102 }
 0x19c   :  { %v104_v41 = vsub.f32 %v100_v39, %v103_v40 }
 0x19e   :  { %v105_v42 = vmul.f32 1.442695, %v104_v41 }
 0x1a0   :  { %121 = vpow2.f32 %v105_v42 }
 0x1a6   :  { %v122_v43 = vpop.eup %121 }
 0x1a7   :  { %107 = vadd.xlane.f32.xlu0 %v122_v43 }
 0x21a   :  { %v108_v44 = vpop.xlane.xlu0 %107 }
 0x21b   :  { %123 = vlog2.f32 %v108_v44 }
 0x221   :  { %v124_v45 = vpop.eup %123 }
 0x222   :  { %v110_v46 = vmul.f32 0.6931472, %v124_v45 }
 0x224   :  { %v111_v47 = vsub.f32 %v104_v41, %v110_v46 }
 0x226   :  { %112 = vst [vmem:[%s268_s5] sm:$0xff] %v111_v47 }

</bundles_post_ra>
